<compile_context>
chip_gen: v5e
topology: v5e:2x2
jax: 0.10.0
libtpu: 0.0.40
codegen_flags: <defaults>
</compile_context>

<pallas_src>
import math
from functools import partial

import jax
import jax.numpy as jnp
from jax import lax
from jax.experimental import pallas as pl
from jax.experimental.pallas import tpu as pltpu


def self_attention_kernel(x_ref, wq_ref, wk_ref, wv_ref, gamma_ref, beta_ref,
                          o_ref, *, block_batch, seq_len, use_reassoc, eps):
    rows, d = x_ref.shape                      # rows = block_batch * seq_len
    bt, n = block_batch, seq_len
    x = x_ref[...]                             # (rows, D), input dtype

    # Three clean 2-D MXU matmuls over the flattened row slab (M = Bt*N).
    # The 1/sqrt(dim_k) scale was folded into wk in the wrapper.
    q = jnp.dot(x, wq_ref[...], preferred_element_type=jnp.float32)   # (rows, Dq)
    k = jnp.dot(x, wk_ref[...], preferred_element_type=jnp.float32)   # (rows, Dk)
    v = jnp.dot(x, wv_ref[...], preferred_element_type=jnp.float32)   # (rows, Dv)

    # MXU operands: bf16 when the model runs in bf16, f32 otherwise.
    # Accumulation stays f32 via preferred_element_type.
    att_dtype = jnp.bfloat16 if x_ref.dtype == jnp.bfloat16 else jnp.float32
    q3 = q.reshape(bt, n, q.shape[-1]).astype(att_dtype)
    k3 = k.reshape(bt, n, k.shape[-1]).astype(att_dtype)
    v3 = v.reshape(bt, n, v.shape[-1]).astype(att_dtype)

    if use_reassoc:
        # No softmax between the bmms, so (q @ k^T) @ v == q @ (k^T @ v);
        # avoids the (N, N) intermediate when N >> Dk, Dv.
        kv = jnp.einsum("bnk,bnv->bkv", k3, v3,
                        preferred_element_type=jnp.float32)            # (Bt,Dk,Dv)
        att = jnp.einsum("bnk,bkv->bnv", q3, kv.astype(att_dtype),
                         preferred_element_type=jnp.float32)            # (Bt,N,Dv)
    else:
        dist = jnp.einsum("bnk,bmk->bnm", q3, k3,
                          preferred_element_type=jnp.float32)           # (Bt,N,N)
        att = jnp.einsum("bnm,bmv->bnv", dist.astype(att_dtype), v3,
                         preferred_element_type=jnp.float32)            # (Bt,N,Dv)

    att2d = att.reshape(rows, d)               # Dv == D (LayerNorm + residual)

    # LayerNorm over the feature dim (PyTorch semantics: biased var), all f32.
    mean = jnp.mean(att2d, axis=-1, keepdims=True)
    var = jnp.mean((att2d - mean) ** 2, axis=-1, keepdims=True)
    ln = (att2d - mean) * lax.rsqrt(var + eps)
    ln = ln * gamma_ref[...] + beta_ref[...]   # (1, D) broadcast

    o_ref[...] = (ln + x.astype(jnp.float32)).astype(o_ref.dtype)


def _tpu_generation_info():
    """(vmem_capacity_bytes, two_tensorcores) with safe fallbacks."""
    vmem_bytes = None
    try:
        vmem_bytes = int(pltpu.get_tpu_info().vmem_capacity_bytes)
    except Exception:
        vmem_bytes = None
    kind = ""
    try:
        kind = jax.devices()[0].device_kind.lower()
    except Exception:
        kind = ""
    if vmem_bytes is None:
        vmem_bytes = (64 << 20) if "v7" in kind else (128 << 20)
    # v7x: 64 MiB VMEM per TensorCore and 2 TensorCores per chip.
    two_cores = ("v7" in kind) or (vmem_bytes <= (64 << 20))
    return vmem_bytes, two_cores


def _per_step_vmem_bytes(bt, n, d, dq, dk, dv, itemsize, use_reassoc):
    rows = bt * n
    io = 2 * 2 * rows * d * itemsize                     # x + out, double-buffered
    w = 2 * (d * (dq + dk + dv) + 2 * d) * itemsize      # weights + gamma/beta
    inter = rows * (dq + dk + dv)                        # q, k, v (f32)
    inter += rows * dv                                   # att
    inter += (bt * dk * dv) if use_reassoc else (bt * n * n)
    return int(1.25 * (io + w + 4 * inter))


def _pick_block_batch(B, N, D, dq, dk, dv, itemsize, budget, two_cores,
                      use_reassoc):
    divisors = [x for x in range(B, 0, -1) if B % x == 0]

    def legal(bt):   # (8,128) tiling: 2nd-to-last block dim multiple of 8 or full
        return bt == B or (bt * N) % 8 == 0

    def steps_ok(bt):
        if not two_cores:
            return True
        steps = B // bt
        return steps >= 2 and steps % 2 == 0   # keep both v7x TCs busy

    for require_steps in (True, False):
        for bt in divisors:
            if not legal(bt):
                continue
            if require_steps and not steps_ok(bt):
                continue
            if _per_step_vmem_bytes(bt, N, D, dq, dk, dv, itemsize,
                                    use_reassoc) <= budget:
                return bt
    # Nothing fits the budget: smallest legal block (least VMEM).
    for bt in reversed(divisors):
        if legal(bt):
            return bt
    return B


def self_attention(x, wq_t, wk_t, wv_t, gamma, beta, *, dim_k, eps=1e-5,
                   block_batch=None):
    B, N, D = x.shape
    Dq, Dk, Dv = wq_t.shape[1], wk_t.shape[1], wv_t.shape[1]
    assert Dq == Dk, "bmm(q, k^T) requires dim_q == dim_k"
    assert Dv == D, "LayerNorm(dim) + residual require dim_v == dim"
    assert Dk == dim_k

    # Fold the 1/sqrt(dim_k) attention scale into Wk (exact: no softmax).
    wk_scaled = (wk_t * (1.0 / math.sqrt(dim_k))).astype(wk_t.dtype)

    gamma2 = jnp.asarray(gamma, dtype=jnp.float32).reshape(1, D)
    beta2 = jnp.asarray(beta, dtype=jnp.float32).reshape(1, D)

    # 2-D row slabs: projection matmul + DMAs need no in-kernel input reshape.
    x2d = x.reshape(B * N, D)

    # Shape-aware association: reassociated q@(k^T v) only when it is cheaper.
    use_reassoc = (Dq + Dk) * Dv < N * (Dk + Dv)

    itemsize = jnp.dtype(x.dtype).itemsize
    vmem_capacity, two_cores = _tpu_generation_info()
    if vmem_capacity <= (64 << 20):                       # v7x-class
        vmem_limit = vmem_capacity - (24 << 20)           # ~40 MiB, Mosaic headroom
    else:                                                 # v5e / v6e (128 MiB)
        vmem_limit = min(96 << 20, vmem_capacity - (32 << 20))
    vmem_limit = int(max(vmem_limit, 16 << 20))
    budget = vmem_limit // 2

    if block_batch is not None:
        Bt = block_batch
        assert B % Bt == 0, "block_batch must divide batch"
    else:
        Bt = _pick_block_batch(B, N, D, Dq, Dk, Dv, itemsize, budget,
                               two_cores, use_reassoc)
    grid = (B // Bt,)
    rows_per_step = Bt * N

    if use_reassoc:
        attn_flops = 2 * B * N * Dk * Dv + 2 * B * N * Dq * Dv
    else:
        attn_flops = 2 * B * N * N * Dk + 2 * B * N * N * Dv
    flops = 2 * B * N * D * (Dq + Dk + Dv) + attn_flops + 10 * B * N * D
    cost = pl.CostEstimate(
        flops=int(flops),
        transcendentals=int(B * N),                       # rsqrt per row
        bytes_accessed=int((2 * B * N * D + D * (Dq + Dk + Dv) + 2 * D)
                           * itemsize),
    )

    kernel = partial(self_attention_kernel, block_batch=Bt, seq_len=N,
                     use_reassoc=use_reassoc, eps=eps)

    out2d = pl.pallas_call(
        kernel,
        out_shape=jax.ShapeDtypeStruct((B * N, D), x.dtype),
        grid=grid,
        in_specs=[
            pl.BlockSpec((rows_per_step, D), lambda b: (b, 0)),   # x slab
            pl.BlockSpec((D, Dq), lambda b: (0, 0)),              # Wq^T
            pl.BlockSpec((D, Dk), lambda b: (0, 0)),              # Wk^T (pre-scaled)
            pl.BlockSpec((D, Dv), lambda b: (0, 0)),              # Wv^T
            pl.BlockSpec((1, D), lambda b: (0, 0)),               # LayerNorm gamma
            pl.BlockSpec((1, D), lambda b: (0, 0)),               # LayerNorm beta
        ],
        out_specs=pl.BlockSpec((rows_per_step, D), lambda b: (b, 0)),
        compiler_params=pltpu.CompilerParams(
            dimension_semantics=("parallel",),
            vmem_limit_bytes=vmem_limit,
        ),
        cost_estimate=cost,
    )(x2d, wq_t, wk_scaled, wv_t, gamma2, beta2)

    return out2d.reshape(B, N, D)


def self_attention_ref(x, wq_t, wk_t, wv_t, gamma, beta, *, dim_k, eps=1e-5):
    """Pure-JAX reference matching the PyTorch forward (original association)."""
    q = x @ wq_t
    k = x @ wk_t
    v = x @ wv_t
    dist = jnp.einsum("bnd,bmd->bnm", q, k) * (1.0 / math.sqrt(dim_k))
    att = jnp.einsum("bnm,bmd->bnd", dist, v)
    mean = jnp.mean(att, axis=-1, keepdims=True)
    var = jnp.mean((att - mean) ** 2, axis=-1, keepdims=True)
    ln = (att - mean) / jnp.sqrt(var + eps) * gamma.reshape(-1) + beta.reshape(-1)
    return ln + x


if __name__ == "__main__":
    # Module config: dim_q == dim_k (needed by bmm), dim_v == dim (LN + residual)
    batch, n, dim = 8, 8, 32
    dim_q = dim_k = 16
    dim_v = dim

    key = jax.random.PRNGKey(0)
    kx, kq, kk, kv, kg, kb = jax.random.split(key, 6)

    x = jax.random.normal(kx, (batch, n, dim), dtype=jnp.float32)

    # nn.Linear(dim, out, bias=False) weight is (out, dim); store transposed (dim, out)
    bound = 1.0 / math.sqrt(dim)
    wq_t = jax.random.uniform(kq, (dim, dim_q), minval=-bound, maxval=bound,
                              dtype=jnp.float32)
    wk_t = jax.random.uniform(kk, (dim, dim_k), minval=-bound, maxval=bound,
                              dtype=jnp.float32)
    wv_t = jax.random.uniform(kv, (dim, dim_v), minval=-bound, maxval=bound,
                              dtype=jnp.float32)

    # LayerNorm affine params (PyTorch default is ones/zeros; randomized here)
    gamma = 1.0 + 0.1 * jax.random.normal(kg, (1, dim), dtype=jnp.float32)
    beta = 0.1 * jax.random.normal(kb, (1, dim), dtype=jnp.float32)

    out = self_attention(x, wq_t, wk_t, wv_t, gamma, beta, dim_k=dim_k)
    out = jax.block_until_ready(out)

    ref = self_attention_ref(x, wq_t, wk_t, wv_t, gamma, beta, dim_k=dim_k)
    assert out.shape == (batch, n, dim)
    # Folded scale / FP reassociation -> tiny bit-level diffs expected.
    assert jnp.allclose(out, ref, atol=2e-4, rtol=2e-4), "mismatch vs reference"

    print("KERNEL_OK")
</pallas_src>

<mosaic_0001>
module attributes {stable_mosaic.version = 11 : i64} {
  func.func @self_attention_kernel(%arg0: i32, %arg1: memref<64x32xf32, #tpu.memory_space<vmem>>, %arg2: memref<32x16xf32, #tpu.memory_space<vmem>>, %arg3: memref<32x16xf32, #tpu.memory_space<vmem>>, %arg4: memref<32x32xf32, #tpu.memory_space<vmem>>, %arg5: memref<1x32xf32, #tpu.memory_space<vmem>>, %arg6: memref<1x32xf32, #tpu.memory_space<vmem>>, %arg7: memref<64x32xf32, #tpu.memory_space<vmem>>) attributes {dimension_semantics = [#tpu.dimension_semantics<parallel>], iteration_bounds = array<i64: 1>, scalar_prefetch = 0 : i64, scratch_operands = 0 : i64, tpu.core_type = #tpu.core_type<tc>, window_params = [{transform_indices = @transform_0, window_bounds = array<i64: 64, 32>}, {pipeline_mode = #tpu.pipeline_mode<synchronous>, transform_indices = @transform_1, window_bounds = array<i64: 32, 16>}, {pipeline_mode = #tpu.pipeline_mode<synchronous>, transform_indices = @transform_2, window_bounds = array<i64: 32, 16>}, {pipeline_mode = #tpu.pipeline_mode<synchronous>, transform_indices = @transform_3, window_bounds = array<i64: 32, 32>}, {pipeline_mode = #tpu.pipeline_mode<synchronous>, transform_indices = @transform_4, window_bounds = array<i64: 1, 32>}, {pipeline_mode = #tpu.pipeline_mode<synchronous>, transform_indices = @transform_5, window_bounds = array<i64: 1, 32>}, {transform_indices = @transform_6, window_bounds = array<i64: 64, 32>}]} {
    %c0 = arith.constant 0 : index
    %c0_0 = arith.constant 0 : index
    %0 = vector.load %arg1[%c0, %c0_0] : memref<64x32xf32, #tpu.memory_space<vmem>>, vector<64x32xf32>
    %c0_1 = arith.constant 0 : index
    %c0_2 = arith.constant 0 : index
    %1 = vector.load %arg2[%c0_1, %c0_2] : memref<32x16xf32, #tpu.memory_space<vmem>>, vector<32x16xf32>
    %cst = arith.constant dense<0.000000e+00> : vector<64x16xf32>
    %2 = tpu.matmul %0, %1, %cst {dimension_numbers = #tpu.dot_dimension_numbers<[1], [0], [0], [1], [0, 0, 1, 1], [], []>} : vector<64x32xf32>, vector<32x16xf32>, vector<64x16xf32> -> vector<64x16xf32>
    %c0_3 = arith.constant 0 : index
    %c0_4 = arith.constant 0 : index
    %3 = vector.load %arg3[%c0_3, %c0_4] : memref<32x16xf32, #tpu.memory_space<vmem>>, vector<32x16xf32>
    %cst_5 = arith.constant dense<0.000000e+00> : vector<64x16xf32>
    %4 = tpu.matmul %0, %3, %cst_5 {dimension_numbers = #tpu.dot_dimension_numbers<[1], [0], [0], [1], [0, 0, 1, 1], [], []>} : vector<64x32xf32>, vector<32x16xf32>, vector<64x16xf32> -> vector<64x16xf32>
    %c0_6 = arith.constant 0 : index
    %c0_7 = arith.constant 0 : index
    %5 = vector.load %arg4[%c0_6, %c0_7] : memref<32x32xf32, #tpu.memory_space<vmem>>, vector<32x32xf32>
    %cst_8 = arith.constant dense<0.000000e+00> : vector<64x32xf32>
    %6 = tpu.matmul %0, %5, %cst_8 {dimension_numbers = #tpu.dot_dimension_numbers<[1], [0], [0], [1], [0, 0, 1, 1], [], []>} : vector<64x32xf32>, vector<32x32xf32>, vector<64x32xf32> -> vector<64x32xf32>
    %7 = vector.shape_cast %2 : vector<64x16xf32> to vector<8x8x16xf32>
    %8 = vector.shape_cast %4 : vector<64x16xf32> to vector<8x8x16xf32>
    %9 = vector.shape_cast %6 : vector<64x32xf32> to vector<8x8x32xf32>
    "tpu.trace_start"() <{level = 10 : i32, message = "bnk,bmk->bnm"}> : () -> ()
    %cst_9 = arith.constant dense<0.000000e+00> : vector<8x8x8xf32>
    %10 = tpu.matmul %7, %8, %cst_9 {dimension_numbers = #tpu.dot_dimension_numbers<[2], [2], [1], [1], [0, 0, 0, 1, 1, 1], [0], [0]>} : vector<8x8x16xf32>, vector<8x8x16xf32>, vector<8x8x8xf32> -> vector<8x8x8xf32>
    "tpu.trace_stop"() : () -> ()
    "tpu.trace_start"() <{level = 10 : i32, message = "bnm,bmv->bnv"}> : () -> ()
    %cst_10 = arith.constant dense<0.000000e+00> : vector<8x8x32xf32>
    %11 = tpu.matmul %10, %9, %cst_10 {dimension_numbers = #tpu.dot_dimension_numbers<[2], [1], [1], [2], [0, 0, 0, 1, 1, 2], [0], [0]>} : vector<8x8x8xf32>, vector<8x8x32xf32>, vector<8x8x32xf32> -> vector<8x8x32xf32>
    "tpu.trace_stop"() : () -> ()
    %12 = vector.shape_cast %11 : vector<8x8x32xf32> to vector<64x32xf32>
    %cst_11 = arith.constant dense<0.000000e+00> : vector<64xf32>
    %13 = vector.multi_reduction <add>, %12, %cst_11 [1] : vector<64x32xf32> to vector<64xf32>
    %14 = vector.shape_cast %13 : vector<64xf32> to vector<64x1xf32>
    %cst_12 = arith.constant 3.200000e+01 : f32
    %15 = vector.broadcast %cst_12 : f32 to vector<64x1xf32>
    %16 = arith.divf %14, %15 : vector<64x1xf32>
    %17 = vector.broadcast %16 : vector<64x1xf32> to vector<64x32xf32>
    %18 = arith.subf %12, %17 : vector<64x32xf32>
    %19 = arith.mulf %18, %18 : vector<64x32xf32>
    %cst_13 = arith.constant dense<0.000000e+00> : vector<64xf32>
    %20 = vector.multi_reduction <add>, %19, %cst_13 [1] : vector<64x32xf32> to vector<64xf32>
    %21 = vector.shape_cast %20 : vector<64xf32> to vector<64x1xf32>
    %cst_14 = arith.constant 3.200000e+01 : f32
    %22 = vector.broadcast %cst_14 : f32 to vector<64x1xf32>
    %23 = arith.divf %21, %22 : vector<64x1xf32>
    %24 = vector.broadcast %16 : vector<64x1xf32> to vector<64x32xf32>
    %25 = arith.subf %12, %24 : vector<64x32xf32>
    %cst_15 = arith.constant 9.99999974E-6 : f32
    %26 = vector.broadcast %cst_15 : f32 to vector<64x1xf32>
    %27 = arith.addf %23, %26 : vector<64x1xf32>
    %28 = math.rsqrt %27 : vector<64x1xf32>
    %29 = vector.broadcast %28 : vector<64x1xf32> to vector<64x32xf32>
    %30 = arith.mulf %25, %29 : vector<64x32xf32>
    %c0_16 = arith.constant 0 : index
    %c0_17 = arith.constant 0 : index
    %31 = vector.load %arg5[%c0_16, %c0_17] : memref<1x32xf32, #tpu.memory_space<vmem>>, vector<1x32xf32>
    %32 = vector.broadcast %31 : vector<1x32xf32> to vector<64x32xf32>
    %33 = arith.mulf %30, %32 : vector<64x32xf32>
    %c0_18 = arith.constant 0 : index
    %c0_19 = arith.constant 0 : index
    %34 = vector.load %arg6[%c0_18, %c0_19] : memref<1x32xf32, #tpu.memory_space<vmem>>, vector<1x32xf32>
    %35 = vector.broadcast %34 : vector<1x32xf32> to vector<64x32xf32>
    %36 = arith.addf %33, %35 : vector<64x32xf32>
    %37 = arith.addf %36, %0 : vector<64x32xf32>
    %c0_20 = arith.constant 0 : index
    %c0_21 = arith.constant 0 : index
    %38 = vector.load %arg7[%c0_20, %c0_21] : memref<64x32xf32, #tpu.memory_space<vmem>>, vector<64x32xf32>
    tpu.vector_store %arg7[%c0_20, %c0_21], %37 {strides = array<i32>} : memref<64x32xf32, #tpu.memory_space<vmem>>, vector<64x32xf32>,
    return
  }
  func.func @transform_0(%arg0: i32) -> (i32, i32) {
    %c0_i32 = arith.constant 0 : i32
    %c0_i32_0 = arith.constant 0 : i32
    return %arg0, %c0_i32 : i32, i32
  }
  func.func @transform_1(%arg0: i32) -> (i32, i32) {
    %c0_i32 = arith.constant 0 : i32
    %c0_i32_0 = arith.constant 0 : i32
    %c0_i32_1 = arith.constant 0 : i32
    return %c0_i32, %c0_i32_0 : i32, i32
  }
  func.func @transform_2(%arg0: i32) -> (i32, i32) {
    %c0_i32 = arith.constant 0 : i32
    %c0_i32_0 = arith.constant 0 : i32
    %c0_i32_1 = arith.constant 0 : i32
    return %c0_i32, %c0_i32_0 : i32, i32
  }
  func.func @transform_3(%arg0: i32) -> (i32, i32) {
    %c0_i32 = arith.constant 0 : i32
    %c0_i32_0 = arith.constant 0 : i32
    %c0_i32_1 = arith.constant 0 : i32
    return %c0_i32, %c0_i32_0 : i32, i32
  }
  func.func @transform_4(%arg0: i32) -> (i32, i32) {
    %c0_i32 = arith.constant 0 : i32
    %c0_i32_0 = arith.constant 0 : i32
    %c0_i32_1 = arith.constant 0 : i32
    return %c0_i32, %c0_i32_0 : i32, i32
  }
  func.func @transform_5(%arg0: i32) -> (i32, i32) {
    %c0_i32 = arith.constant 0 : i32
    %c0_i32_0 = arith.constant 0 : i32
    %c0_i32_1 = arith.constant 0 : i32
    return %c0_i32, %c0_i32_0 : i32, i32
  }
  func.func @transform_6(%arg0: i32) -> (i32, i32) {
    %c0_i32 = arith.constant 0 : i32
    %c0_i32_0 = arith.constant 0 : i32
    return %arg0, %c0_i32 : i32, i32
  }
}

</mosaic_0001>

<bundles_post_ra>
// kernel: tpu_custom_call.1
= control target key start
LH: loop header
LB: loop body
LE: loop exit
PB: predicated region body
PF: predicated region fallthrough
CT: control target
= control target key end

     0   :  { %vm35_vm0 = vcmask 261120   ;;  %vm191_vm1 = vcmask 130048   ;;  %vm400_vm2 = vcmask 64512   ;;  %s1205_s2 = inlined_call_operand.vmem [shape: f32[32,16], index: 2, kind: input, shape index: {}]   ;;  %s1206_s1 = inlined_call_operand.vmem [shape: f32[32,16], index: 1, kind: input, shape index: {}]   ;;  %s1207_s0 = inlined_call_operand.vmem [shape: f32[64,32], index: 0, kind: input, shape index: {}]   ;;  %s1208_s3 = inlined_call_operand.vmem [shape: f32[32,32], index: 3, kind: input, shape index: {}]   ;;  %s1209_s4 = inlined_call_operand.vmem [shape: f32[1,32], index: 4, kind: input, shape index: {}]   ;;  %s1210_s5 = inlined_call_operand.vmem [shape: f32[1,32], index: 5, kind: input, shape index: {}]   ;;  %s1211_s6 = inlined_call_operand.vmem [shape: f32[64,32], index: 6, kind: output, shape index: {}]  }
   0x1   :  { %v104_v0 = vld [vmem:[%s1205_s2 + $0x18] sm:$0xff]  ;;  %v103_v1 = vld [vmem:[%s1205_s2 + $0x10] sm:$0xff]  ;;  %v102_v4 = vld [vmem:[%s1205_s2 + $0x8] sm:$0xff] }
   0x2   :  { %v34_v2 = vld [vmem:[%s1206_s1 + $0x18] sm:$0xff]  ;;  %117 = vmatpush.msra.mxu1 %v104_v0  ;;  %v33_v3 = vld [vmem:[%s1206_s1 + $0x10] sm:$0xff]  ;;  %v32_v5 = vld [vmem:[%s1206_s1 + $0x8] sm:$0xff] }
   0x3   :  { %72 = vmatpush.msra.mxu0 %v34_v2  ;;  %v101_v6 = vld [vmem:[%s1205_s2] sm:$0xff]  ;;  %v953_v9 = vld [vmem:[%s1207_s0 + $0x8] sm:$0xff]  ;;  %v962_v10 = vld [vmem:[%s1207_s0 + $0x10] sm:$0xff] }
   0x4   :  { %118 = vmatpush.msra.mxu1 %v103_v1  ;;  %v31_v7 = vld [vmem:[%s1206_s1] sm:$0xff]  ;;  %v971_v11 = vld [vmem:[%s1207_s0 + $0x18] sm:$0xff]  ;;  %v148_v13 = vld [vmem:[%s1208_s3 + $0x10] sm:$0xff] }
   0x5   :  { %73 = vmatpush.msra.mxu0 %v33_v3  ;;  %v944_v8 = vld [vmem:[%s1207_s0] sm:$0xff]  ;;  %v149_v12 = vld [vmem:[%s1208_s3 + $0x18] sm:$0xff]  ;;  %v147_v14 = vld [vmem:[%s1208_s3 + $0x8] sm:$0xff] }
   0x6   :  { %119 = vmatpush.msra.mxu1 %v102_v4  ;;  %162 = vmatpush.msra.mxu2 %v149_v12  ;;  %v146_v15 = vld [vmem:[%s1208_s3] sm:$0xff]  ;;  %v1003_v17 = vld [vmem:[%s1207_s0 + $0x28] sm:$0xff]  ;;  %v1014_v18 = vld [vmem:[%s1207_s0 + $0x30] sm:$0xff]  ;;  %v881_v4 = vmov 32.0  }
   0x7   :  { %74 = vmatpush.msra.mxu0 %v32_v5  ;;  %v992_v16 = vld [vmem:[%s1207_s0 + $0x20] sm:$0xff]  ;;  %v1025_v19 = vld [vmem:[%s1207_s0 + $0x38] sm:$0xff]  ;;  %863 = vrcp.f32 %v881_v4 }
   0x8   :  { %120 = vmatpush.msra.mxu1 %v101_v6  ;;  %163 = vmatpush.msra.mxu2 %v148_v13 }
   0x9   :  { %75 = vmatpush.msra.mxu0 %v31_v7  ;;  %820 = vmatmul.msk.f32.vlgmr.msra.gmra.mxu1 %vm35_vm0, %v944_v8 }
   0xa   :  { %812 = vmatmul.msk.f32.vlgmr.msra.gmra.mxu0 %vm35_vm0, %v944_v8  ;;  %164 = vmatpush.msra.mxu2 %v147_v14 }
   0xc   :  { %165 = vmatpush.msra.mxu2 %v146_v15 }
   0xd   :  { %828 = vmatmul.msk.f32.vlgmr.msra.gmra.mxu2 %vm35_vm0, %v944_v8  ;;  %v864_v5 = vpop.eup %863 }
   0xe   :  { %v610_v6 = vmul.f32 32.0, %v864_v5  ;;  %vm614_vm3 = vweird.f32 %v864_v5 }
  0x10   :  { %v611_v7 = vsub.f32 1.0, %v610_v6 }
  0x11   :  { %821 = vmatmul.msk.f32.gmra.mxu1 %vm35_vm0, %v953_v9 }
  0x12   :  { %813 = vmatmul.msk.f32.gmra.mxu0 %vm35_vm0, %v953_v9  ;;  %v612_v12 = vmul.f32 %v864_v5, %v611_v7 }
  0x14   :  { %v613_v13 = vadd.f32 %v864_v5, %v612_v12 }
  0x15   :  { %829 = vmatmul.msk.f32.gmra.mxu2 %vm35_vm0, %v953_v9 }
  0x16   :  { %v1073_v14 = vsel %vm614_vm3, %v864_v5, %v613_v13 }
  0x19   :  { %822 = vmatmul.msk.f32.gmra.mxu1 %vm35_vm0, %v962_v10 }
  0x1a   :  { %814 = vmatmul.msk.f32.gmra.mxu0 %vm35_vm0, %v962_v10 }
  0x1d   :  { %830 = vmatmul.msk.f32.gmra.mxu2 %vm35_vm0, %v962_v10 }
  0x21   :  { %823 = vmatmul.msk.f32.gmra.mxu1 %vm35_vm0, %v971_v11 }
  0x22   :  { %815 = vmatmul.msk.f32.gmra.mxu0 %vm35_vm0, %v971_v11 }
  0x25   :  { %831 = vmatmul.msk.f32.gmra.mxu2 %vm35_vm0, %v971_v11 }
  0x29   :  { %824 = vmatmul.msk.f32.gmra.mxu1 %vm35_vm0, %v992_v16 }
  0x2a   :  { %816 = vmatmul.msk.f32.gmra.mxu0 %vm35_vm0, %v992_v16 }
  0x2d   :  { %832 = vmatmul.msk.f32.gmra.mxu2 %vm35_vm0, %v992_v16 }
  0x31   :  { %825 = vmatmul.msk.f32.gmra.mxu1 %vm35_vm0, %v1003_v17 }
  0x32   :  { %817 = vmatmul.msk.f32.gmra.mxu0 %vm35_vm0, %v1003_v17 }
  0x35   :  { %833 = vmatmul.msk.f32.gmra.mxu2 %vm35_vm0, %v1003_v17 }
  0x39   :  { %826 = vmatmul.msk.f32.gmra.mxu1 %vm35_vm0, %v1014_v18 }
  0x3a   :  { %818 = vmatmul.msk.f32.gmra.mxu0 %vm35_vm0, %v1014_v18 }
  0x3d   :  { %834 = vmatmul.msk.f32.gmra.mxu2 %vm35_vm0, %v1014_v18 }
  0x41   :  { %827 = vmatmul.msk.f32.gmra.mxu1 %vm35_vm0, %v1025_v19 }
  0x42   :  { %819 = vmatmul.msk.f32.gmra.mxu0 %vm35_vm0, %v1025_v19 }
  0x45   :  { %835 = vmatmul.msk.f32.gmra.mxu2 %vm35_vm0, %v1025_v19 }
  0x86   :  { %v122_v20 = vpop.f32.mrf.mxu1 }
  0x87   :  { %v77_v21 = vpop.f32.mrf.mxu0  ;;  %836 = vmatpush.xpose.msk.msra.mxu3 %vm191_vm1, %v122_v20 }
  0x8a   :  { %837 = vmatmul.msk.f32.vlgmr.msra.gmra.mxu3 %vm191_vm1, %v77_v21 }
  0x8e   :  { %v125_v22 = vpop.f32.mrf.mxu1 }
  0x8f   :  { %v80_v23 = vpop.f32.mrf.mxu0  ;;  %838 = vmatpush.xpose.msk.msrb.mxu3 %vm191_vm1, %v125_v22 }
  0x90   :  { %v167_v30 = vpop.f32.mrf.mxu2 }
  0x92   :  { %839 = vmatmul.msk.f32.vlgmr.msrb.gmra.mxu3 %vm191_vm1, %v80_v23 }
  0x96   :  { %v128_v24 = vpop.f32.mrf.mxu1 }
  0x97   :  { %v83_v25 = vpop.f32.mrf.mxu0  ;;  %840 = vmatpush.xpose.msk.msra.mxu3 %vm191_vm1, %v128_v24 }
  0x98   :  { %v170_v33 = vpop.f32.mrf.mxu2 }
  0x99   :  { %442 = vmatpush.msrb.mxu0 %v170_v33 }
  0x9a   :  { %841 = vmatmul.msk.f32.vlgmr.msra.gmra.mxu3 %vm191_vm1, %v83_v25 }
  0x9e   :  { %v131_v26 = vpop.f32.mrf.mxu1 }
  0x9f   :  { %v86_v27 = vpop.f32.mrf.mxu0  ;;  %842 = vmatpush.xpose.msk.msrb.mxu3 %vm191_vm1, %v131_v26 }
  0xa0   :  { %v173_v36 = vpop.f32.mrf.mxu2 }
  0xa1   :  { %465 = vmatpush.msrb.mxu1 %v173_v36 }
  0xa2   :  { %843 = vmatmul.msk.f32.vlgmr.msrb.gmra.mxu3 %vm191_vm1, %v86_v27 }
  0xa6   :  { %v134_v28 = vpop.f32.mrf.mxu1 }
  0xa7   :  { %v89_v29 = vpop.f32.mrf.mxu0  ;;  %844 = vmatpush.xpose.msk.msra.mxu3 %vm191_vm1, %v134_v28 }
  0xa8   :  { %v176_v39 = vpop.f32.mrf.mxu2 }
  0xa9   :  { %488 = vmatpush.msrb.mxu2 %v176_v39 }
  0xaa   :  { %845 = vmatmul.msk.f32.vlgmr.msra.gmra.mxu3 %vm191_vm1, %v89_v29 }
  0xae   :  { %v137_v31 = vpop.f32.mrf.mxu1 }
  0xaf   :  { %v92_v32 = vpop.f32.mrf.mxu0  ;;  %846 = vmatpush.xpose.msk.msrb.mxu3 %vm191_vm1, %v137_v31 }
  0xb0   :  { %v179_v40 = vpop.f32.mrf.mxu2 }
  0xb2   :  { %847 = vmatmul.msk.f32.vlgmr.msrb.gmra.mxu3 %vm191_vm1, %v92_v32 }
  0xb6   :  { %v140_v34 = vpop.f32.mrf.mxu1 }
  0xb7   :  { %v95_v35 = vpop.f32.mrf.mxu0  ;;  %848 = vmatpush.xpose.msk.msra.mxu3 %vm191_vm1, %v140_v34 }
  0xb8   :  { %v182_v42 = vpop.f32.mrf.mxu2 }
  0xb9   :  { %534 = vmatpush.msra.mxu0 %v182_v42 }
  0xba   :  { %849 = vmatmul.msk.f32.vlgmr.msra.gmra.mxu3 %vm191_vm1, %v95_v35 }
  0xbe   :  { %v143_v37 = vpop.f32.mrf.mxu1 }
  0xbf   :  { %850 = vmatpush.xpose.msk.msrb.mxu3 %vm191_vm1, %v143_v37  ;;  %v98_v38 = vpop.f32.mrf.mxu0 }
  0xc0   :  { %v185_v44 = vpop.f32.mrf.mxu2 }
  0xc1   :  { %557 = vmatpush.msra.mxu1 %v185_v44 }
  0xc2   :  { %851 = vmatmul.msk.f32.vlgmr.msrb.gmra.mxu3 %vm191_vm1, %v98_v38 }
  0xc3   :  { %419 = vmatpush.msra.mxu3 %v167_v30 }
  0xc5   :  { %511 = vmatpush.msrb.mxu3 %v179_v40 }
  0xc8   :  { %v188_v46 = vpop.f32.mrf.mxu2 }
  0xc9   :  { %580 = vmatpush.msra.mxu2 %v188_v46 }
 0x10d   :  { %v215_v41 = vpop.f32.mrf.mxu3 }
 0x10e   :  { %852 = vmatmul.msk.f32.vlgmr.msra.gmra.mxu3 %vm400_vm2, %v215_v41 }
 0x115   :  { %v241_v43 = vpop.f32.mrf.mxu3 }
 0x116   :  { %853 = vmatmul.msk.f32.vlgmr.msrb.gmra.mxu0 %vm400_vm2, %v241_v43 }
 0x11d   :  { %v267_v45 = vpop.f32.mrf.mxu3 }
 0x11e   :  { %854 = vmatmul.msk.f32.vlgmr.msrb.gmra.mxu1 %vm400_vm2, %v267_v45 }
 0x125   :  { %v293_v47 = vpop.f32.mrf.mxu3 }
 0x126   :  { %855 = vmatmul.msk.f32.vlgmr.msrb.gmra.mxu2 %vm400_vm2, %v293_v47 }
 0x12d   :  { %v319_v48 = vpop.f32.mrf.mxu3 }
 0x12e   :  { %856 = vmatmul.msk.f32.vlgmr.msrb.gmra.mxu3 %vm400_vm2, %v319_v48 }
 0x135   :  { %v345_v49 = vpop.f32.mrf.mxu3 }
 0x136   :  { %857 = vmatmul.msk.f32.vlgmr.msra.gmra.mxu0 %vm400_vm2, %v345_v49 }
 0x13d   :  { %v371_v50 = vpop.f32.mrf.mxu3 }
 0x13e   :  { %858 = vmatmul.msk.f32.vlgmr.msra.gmra.mxu1 %vm400_vm2, %v371_v50 }
 0x145   :  { %v397_v51 = vpop.f32.mrf.mxu3 }
 0x146   :  { %859 = vmatmul.msk.f32.vlgmr.msra.gmra.mxu2 %vm400_vm2, %v397_v51 }
 0x191   :  { %v421_v52 = vpop.f32.mrf.mxu3 }
 0x192   :  { %v585_v53 = vsel %vm35_vm0, %v421_v52, 0.0 }
 0x193   :  { %586 = vadd.xlane.f32.xlu0 %v585_v53  ;;  %v444_v54 = vpop.f32.mrf.mxu0 }
 0x194   :  { %v588_v55 = vsel %vm35_vm0, %v444_v54, 0.0 }
 0x19b   :  { %v467_v56 = vpop.f32.mrf.mxu1  ;;  %589 = vadd.xlane.f32.xlu0 %v588_v55 }
 0x19c   :  { %v591_v57 = vsel %vm35_vm0, %v467_v56, 0.0 }
 0x19d   :  { %592 = vadd.xlane.f32.xlu1 %v591_v57 }
 0x1a9   :  { %v490_v58 = vpop.f32.mrf.mxu2 }
 0x1aa   :  { %v594_v59 = vsel %vm35_vm0, %v490_v58, 0.0 }
 0x1ab   :  { %595 = vadd.xlane.f32.xlu1 %v594_v59 }
 0x1b1   :  { %v513_v60 = vpop.f32.mrf.mxu3 }
 0x1b2   :  { %v597_v61 = vsel %vm35_vm0, %v513_v60, 0.0 }
 0x1b3   :  { %598 = vadd.xlane.f32.xlu2 %v597_v61  ;;  %v536_v62 = vpop.f32.mrf.mxu0 }
 0x1b4   :  { %v600_v63 = vsel %vm35_vm0, %v536_v62, 0.0 }
 0x1bb   :  { %v559_v0 = vpop.f32.mrf.mxu1  ;;  %601 = vadd.xlane.f32.xlu2 %v600_v63 }
 0x1bc   :  { %v603_v1 = vsel %vm35_vm0, %v559_v0, 0.0 }
 0x1bd   :  { %604 = vadd.xlane.f32.xlu0 %v603_v1 }
 0x1c9   :  { %v582_v2 = vpop.f32.mrf.mxu2 }
 0x1ca   :  { %v606_v3 = vsel %vm35_vm0, %v582_v2, 0.0 }
 0x1cb   :  { %607 = vadd.xlane.f32.xlu1 %v606_v3 }
 0x206   :  { %v587_v15 = vpop.xlane.xlu0 %586 }
 0x207   :  { %v616_v20 = vmul.f32 %v1073_v14, %v587_v15 }
 0x209   :  { %v1076_v21 = vsub.f32 %v421_v52, %v616_v20 }
 0x20b   :  { %v632_v22 = vmul.f32 %v1076_v21, %v1076_v21 }
 0x20d   :  { %v640_v23 = vsel %vm35_vm0, %v632_v22, 0.0 }
 0x20e   :  { %v590_v24 = vpop.xlane.xlu0 %589  ;;  %641 = vadd.xlane.f32.xlu2 %v640_v23  ;;  %v1129_v23 = vld [vmem:[%s1209_s4] ss:$0 sm:$0xff] }
 0x20f   :  { %v617_v25 = vmul.f32 %v1073_v14, %v590_v24 }
 0x210   :  { %v593_v26 = vpop.xlane.xlu1 %592 }
 0x211   :  { %v1082_v27 = vsub.f32 %v444_v54, %v617_v25  ;;  %v618_v28 = vmul.f32 %v1073_v14, %v593_v26 }
 0x213   :  { %v1085_v29 = vsub.f32 %v467_v56, %v618_v28  ;;  %v633_v30 = vmul.f32 %v1082_v27, %v1082_v27  ;;  %v1134_v28 = vld [vmem:[%s1210_s5] ss:$0 sm:$0xff] }
 0x215   :  { %v643_v31 = vsel %vm35_vm0, %v633_v30, 0.0  ;;  %v634_v32 = vmul.f32 %v1085_v29, %v1085_v29 }
 0x216   :  { %644 = vadd.xlane.f32.xlu0 %v643_v31 }
 0x217   :  { %v646_v33 = vsel %vm35_vm0, %v634_v32, 0.0 }
 0x218   :  { %647 = vadd.xlane.f32.xlu1 %v646_v33 }
 0x21e   :  { %v596_v34 = vpop.xlane.xlu1 %595 }
 0x21f   :  { %v619_v35 = vmul.f32 %v1073_v14, %v596_v34 }
 0x221   :  { %v1094_v36 = vsub.f32 %v490_v58, %v619_v35 }
 0x223   :  { %v635_v37 = vmul.f32 %v1094_v36, %v1094_v36 }
 0x225   :  { %v649_v38 = vsel %vm35_vm0, %v635_v37, 0.0 }
 0x226   :  { %650 = vadd.xlane.f32.xlu2 %v649_v38  ;;  %v599_v39 = vpop.xlane.xlu2 %598 }
 0x227   :  { %v620_v40 = vmul.f32 %v1073_v14, %v599_v39 }
 0x229   :  { %v1100_v41 = vsub.f32 %v513_v60, %v620_v40 }
 0x22b   :  { %v636_v42 = vmul.f32 %v1100_v41, %v1100_v41 }
 0x22d   :  { %v652_v43 = vsel %vm35_vm0, %v636_v42, 0.0 }
 0x22e   :  { %653 = vadd.xlane.f32.xlu0 %v652_v43  ;;  %v602_v44 = vpop.xlane.xlu2 %601 }
 0x22f   :  { %v621_v45 = vmul.f32 %v1073_v14, %v602_v44 }
 0x230   :  { %v605_v46 = vpop.xlane.xlu0 %604 }
 0x231   :  { %v1106_v47 = vsub.f32 %v536_v62, %v621_v45  ;;  %v622_v48 = vmul.f32 %v1073_v14, %v605_v46 }
 0x233   :  { %v1109_v49 = vsub.f32 %v559_v0, %v622_v48  ;;  %v637_v50 = vmul.f32 %v1106_v47, %v1106_v47 }
 0x235   :  { %v655_v51 = vsel %vm35_vm0, %v637_v50, 0.0  ;;  %v638_v52 = vmul.f32 %v1109_v49, %v1109_v49 }
 0x236   :  { %656 = vadd.xlane.f32.xlu1 %v655_v51 }
 0x237   :  { %v658_v53 = vsel %vm35_vm0, %v638_v52, 0.0 }
 0x238   :  { %659 = vadd.xlane.f32.xlu2 %v658_v53 }
 0x23e   :  { %v608_v54 = vpop.xlane.xlu1 %607 }
 0x23f   :  { %v623_v55 = vmul.f32 %v1073_v14, %v608_v54 }
 0x241   :  { %v1118_v56 = vsub.f32 %v582_v2, %v623_v55 }
 0x243   :  { %v639_v57 = vmul.f32 %v1118_v56, %v1118_v56 }
 0x245   :  { %v661_v58 = vsel %vm35_vm0, %v639_v57, 0.0 }
 0x246   :  { %662 = vadd.xlane.f32.xlu0 %v661_v58 }
 0x281   :  { %v642_v59 = vpop.xlane.xlu2 %641 }
 0x282   :  { %v664_v60 = vmul.f32 %v642_v59, %v1073_v14 }
 0x284   :  { %v672_v61 = vadd.f32 1e-05, %v664_v60 }
 0x286   :  { %865 = vrsqrt.f32 %v672_v61  ;;  %vm686_vm5 = vweird.f32 %v672_v61 }
 0x289   :  { %v645_v62 = vpop.xlane.xlu0 %644 }
 0x28a   :  { %v665_v63 = vmul.f32 %v645_v62, %v1073_v14 }
 0x28b   :  { %v648_v0 = vpop.xlane.xlu1 %647 }
 0x28c   :  { %v866_v1 = vpop.eup %865  ;;  %v673_v3 = vadd.f32 1e-05, %v665_v63  ;;  %v666_v2 = vmul.f32 %v648_v0, %v1073_v14 }
 0x28d   :  { %v681_v4 = vmul.f32 %v866_v1, %v672_v61  ;;  %vm687_vm4 = vweird.f32 %v866_v1 }
 0x28e   :  { %867 = vrsqrt.f32 %v673_v3  ;;  %v674_v5 = vadd.f32 1e-05, %v666_v2  ;;  %vm688_vm6 = vmor %vm686_vm5, %vm687_vm4  ;;  %vm696_vm8 = vweird.f32 %v673_v3 }
 0x28f   :  { %v682_v6 = vmul.f32 %v866_v1, %v681_v4 }
 0x290   :  { %869 = vrsqrt.f32 %v674_v5  ;;  %vm706_vm11 = vweird.f32 %v674_v5 }
 0x291   :  { %v683_v7 = vmul.f32 0.5, %v682_v6 }
 0x293   :  { %v684_v12 = vsub.f32 1.5, %v683_v7 }
 0x294   :  { %v868_v13 = vpop.eup %867 }
 0x295   :  { %v685_v15 = vmul.f32 %v866_v1, %v684_v12  ;;  %v691_v20 = vmul.f32 %v868_v13, %v673_v3  ;;  %vm697_vm7 = vweird.f32 %v868_v13 }
 0x296   :  { %v870_v22 = vpop.eup %869  ;;  %vm698_vm10 = vmor %vm696_vm8, %vm697_vm7 }
 0x297   :  { %v689_v24 = vsel %vm688_vm6, %v866_v1, %v685_v15  ;;  %v692_v25 = vmul.f32 %v868_v13, %v691_v20  ;;  %v701_v26 = vmul.f32 %v870_v22, %v674_v5  ;;  %vm707_vm9 = vweird.f32 %v870_v22 }
 0x298   :  { %v760_v30 = vmul.f32 %v689_v24, %v1076_v21  ;;  %vm708_vm12 = vmor %vm706_vm11, %vm707_vm9 }
 0x299   :  { %v693_v31 = vmul.f32 0.5, %v692_v25  ;;  %v702_v32 = vmul.f32 %v870_v22, %v701_v26  ;;  %v651_v33 = vpop.xlane.xlu2 %650 }
 0x29a   :  { %v772_v34 = vmul.f32 %v1129_v23, %v760_v30  ;;  %v667_v35 = vmul.f32 %v651_v33, %v1073_v14 }
 0x29b   :  { %v694_v37 = vsub.f32 1.5, %v693_v31  ;;  %v703_v38 = vmul.f32 0.5, %v702_v32 }
 0x29c   :  { %v784_v39 = vadd.f32 %v1134_v28, %v772_v34  ;;  %v675_v40 = vadd.f32 1e-05, %v667_v35 }
 0x29d   :  { %v695_v42 = vmul.f32 %v868_v13, %v694_v37  ;;  %v704_v43 = vsub.f32 1.5, %v703_v38 }
 0x29e   :  { %v792_v44 = vadd.f32 %v784_v39, %v944_v8  ;;  %871 = vrsqrt.f32 %v675_v40  ;;  %vm716_vm14 = vweird.f32 %v675_v40 }
 0x29f   :  { %v699_v21 = vsel %vm698_vm10, %v868_v13, %v695_v42  ;;  %v705_v45 = vmul.f32 %v870_v22, %v704_v43 }
 0x2a0   :  { %800 = vst.msk [vmem:[%s1211_s6] sm:$0xff] %vm35_vm0, %v792_v44  ;;  %v761_v46 = vmul.f32 %v699_v21, %v1082_v27 }
 0x2a1   :  { %v709_v48 = vsel %vm708_vm12, %v870_v22, %v705_v45  ;;  %v654_v50 = vpop.xlane.xlu0 %653 }
 0x2a2   :  { %v773_v51 = vmul.f32 %v1129_v23, %v761_v46  ;;  %v762_v52 = vmul.f32 %v709_v48, %v1085_v29  ;;  %v668_v8 = vmul.f32 %v654_v50, %v1073_v14 }
 0x2a4   :  { %v872_v53 = vpop.eup %871  ;;  %v785_v54 = vadd.f32 %v1134_v28, %v773_v51  ;;  %v774_v55 = vmul.f32 %v1129_v23, %v762_v52  ;;  %v676_v57 = vadd.f32 1e-05, %v668_v8 }
 0x2a5   :  { %v711_v58 = vmul.f32 %v872_v53, %v675_v40  ;;  %vm717_vm13 = vweird.f32 %v872_v53 }
 0x2a6   :  { %v793_v59 = vadd.f32 %v785_v54, %v953_v9  ;;  %v786_v27 = vadd.f32 %v1134_v28, %v774_v55  ;;  %873 = vrsqrt.f32 %v676_v57  ;;  %vm718_vm15 = vmor %vm716_vm14, %vm717_vm13  ;;  %vm726_vm2 = vweird.f32 %v676_v57 }
 0x2a7   :  { %v712_v60 = vmul.f32 %v872_v53, %v711_v58 }
 0x2a8   :  { %801 = vst.msk [vmem:[%s1211_s6 + $0x8] sm:$0xff] %vm35_vm0, %v793_v59  ;;  %v794_v29 = vadd.f32 %v786_v27, %v962_v10 }
 0x2a9   :  { %v713_v61 = vmul.f32 0.5, %v712_v60  ;;  %v657_v62 = vpop.xlane.xlu1 %656 }
 0x2aa   :  { %802 = vst.msk [vmem:[%s1211_s6 + $0x10] sm:$0xff] %vm35_vm0, %v794_v29  ;;  %v669_v9 = vmul.f32 %v657_v62, %v1073_v14 }
 0x2ab   :  { %v714_v63 = vsub.f32 1.5, %v713_v61  ;;  %v660_v0 = vpop.xlane.xlu2 %659 }
 0x2ac   :  { %v874_v1 = vpop.eup %873  ;;  %v677_v3 = vadd.f32 1e-05, %v669_v9  ;;  %v670_v2 = vmul.f32 %v660_v0, %v1073_v14 }
 0x2ad   :  { %v715_v4 = vmul.f32 %v872_v53, %v714_v63  ;;  %v721_v5 = vmul.f32 %v874_v1, %v676_v57  ;;  %vm727_vm1 = vweird.f32 %v874_v1 }
 0x2ae   :  { %875 = vrsqrt.f32 %v677_v3  ;;  %v678_v10 = vadd.f32 1e-05, %v670_v2  ;;  %vm728_vm3 = vmor %vm726_vm2, %vm727_vm1  ;;  %vm736_vm5 = vweird.f32 %v677_v3 }
 0x2af   :  { %v719_v6 = vsel %vm718_vm15, %v872_v53, %v715_v4  ;;  %v722_v7 = vmul.f32 %v874_v1, %v721_v5 }
 0x2b0   :  { %v763_v12 = vmul.f32 %v719_v6, %v1094_v36  ;;  %877 = vrsqrt.f32 %v678_v10  ;;  %vm746_vm8 = vweird.f32 %v678_v10 }
 0x2b1   :  { %v723_v13 = vmul.f32 0.5, %v722_v7 }
 0x2b2   :  { %v775_v15 = vmul.f32 %v1129_v23, %v763_v12 }
 0x2b3   :  { %v724_v20 = vsub.f32 1.5, %v723_v13 }
 0x2b4   :  { %v876_v22 = vpop.eup %875  ;;  %v787_v24 = vadd.f32 %v1134_v28, %v775_v15 }
 0x2b5   :  { %v725_v25 = vmul.f32 %v874_v1, %v724_v20  ;;  %v731_v26 = vmul.f32 %v876_v22, %v677_v3  ;;  %vm737_vm4 = vweird.f32 %v876_v22 }
 0x2b6   :  { %v878_v30 = vpop.eup %877  ;;  %v795_v31 = vadd.f32 %v787_v24, %v971_v11  ;;  %vm738_vm7 = vmor %vm736_vm5, %vm737_vm4 }
 0x2b7   :  { %v729_v32 = vsel %vm728_vm3, %v874_v1, %v725_v25  ;;  %v732_v33 = vmul.f32 %v876_v22, %v731_v26  ;;  %v741_v34 = vmul.f32 %v878_v30, %v678_v10  ;;  %vm747_vm6 = vweird.f32 %v878_v30 }
 0x2b8   :  { %803 = vst.msk [vmem:[%s1211_s6 + $0x18] sm:$0xff] %vm35_vm0, %v795_v31  ;;  %v764_v36 = vmul.f32 %v729_v32, %v1100_v41  ;;  %vm748_vm9 = vmor %vm746_vm8, %vm747_vm6 }
 0x2b9   :  { %v733_v35 = vmul.f32 0.5, %v732_v33  ;;  %v742_v37 = vmul.f32 %v878_v30, %v741_v34  ;;  %v663_v38 = vpop.xlane.xlu0 %662 }
 0x2ba   :  { %v776_v39 = vmul.f32 %v1129_v23, %v764_v36  ;;  %v671_v40 = vmul.f32 %v663_v38, %v1073_v14 }
 0x2bb   :  { %v734_v42 = vsub.f32 1.5, %v733_v35  ;;  %v743_v11 = vmul.f32 0.5, %v742_v37 }
 0x2bc   :  { %v788_v43 = vadd.f32 %v1134_v28, %v776_v39  ;;  %v679_v44 = vadd.f32 1e-05, %v671_v40 }
 0x2bd   :  { %v735_v21 = vmul.f32 %v876_v22, %v734_v42  ;;  %v744_v45 = vsub.f32 1.5, %v743_v11 }
 0x2be   :  { %v796_v46 = vadd.f32 %v788_v43, %v992_v16  ;;  %879 = vrsqrt.f32 %v679_v44  ;;  %vm756_vm11 = vweird.f32 %v679_v44 }
 0x2bf   :  { %v739_v41 = vsel %vm738_vm7, %v876_v22, %v735_v21  ;;  %v745_v48 = vmul.f32 %v878_v30, %v744_v45 }
 0x2c0   :  { %804 = vst.msk [vmem:[%s1211_s6 + $0x20] sm:$0xff] %vm35_vm0, %v796_v46  ;;  %v765_v14 = vmul.f32 %v739_v41, %v1106_v47 }
 0x2c1   :  { %v749_v50 = vsel %vm748_vm9, %v878_v30, %v745_v48 }
 0x2c2   :  { %v777_v51 = vmul.f32 %v1129_v23, %v765_v14  ;;  %v766_v52 = vmul.f32 %v749_v50, %v1109_v49 }
 0x2c4   :  { %v880_v8 = vpop.eup %879  ;;  %v789_v16 = vadd.f32 %v1134_v28, %v777_v51  ;;  %v778_v53 = vmul.f32 %v1129_v23, %v766_v52 }
 0x2c5   :  { %v751_v54 = vmul.f32 %v880_v8, %v679_v44  ;;  %vm757_vm10 = vweird.f32 %v880_v8 }
 0x2c6   :  { %v797_v55 = vadd.f32 %v789_v16, %v1003_v17  ;;  %v790_v57 = vadd.f32 %v1134_v28, %v778_v53  ;;  %vm758_vm12 = vmor %vm756_vm11, %vm757_vm10 }
 0x2c7   :  { %v752_v58 = vmul.f32 %v880_v8, %v751_v54 }
 0x2c8   :  { %805 = vst.msk [vmem:[%s1211_s6 + $0x28] sm:$0xff] %vm35_vm0, %v797_v55  ;;  %v798_v47 = vadd.f32 %v790_v57, %v1014_v18 }
 0x2c9   :  { %v753_v59 = vmul.f32 0.5, %v752_v58 }
 0x2ca   :  { %806 = vst.msk [vmem:[%s1211_s6 + $0x30] sm:$0xff] %vm35_vm0, %v798_v47 }
 0x2cb   :  { %v754_v49 = vsub.f32 1.5, %v753_v59 }
 0x2cd   :  { %v755_v27 = vmul.f32 %v880_v8, %v754_v49 }
 0x2cf   :  { %v759_v17 = vsel %vm758_vm12, %v880_v8, %v755_v27 }
 0x2d0   :  { %v767_v60 = vmul.f32 %v759_v17, %v1118_v56 }
 0x2d2   :  { %v779_v29 = vmul.f32 %v1129_v23, %v767_v60 }
 0x2d4   :  { %v791_v61 = vadd.f32 %v1134_v28, %v779_v29 }
 0x2d6   :  { %v799_v18 = vadd.f32 %v791_v61, %v1025_v19 }
 0x2d8   :  { %807 = vst.msk [vmem:[%s1211_s6 + $0x38] sm:$0xff] %vm35_vm0, %v799_v18 }

</bundles_post_ra>
